<compile_context>
chip_gen: v6e
topology: v6e:2x2x1
jax: 0.10.0
libtpu: 0.0.40
codegen_flags: <defaults>
</compile_context>

<pallas_src>
import jax
import jax.numpy as jnp
from jax.experimental import pallas as pl
from jax.experimental.pallas import tpu as pltpu


def _mean_pool_kernel(emb_ref, mask_ref, out_ref, acc_ref, cnt_ref):
    # emb_ref  : (B_T, S_T, D)  native dtype (f32/bf16) in VMEM
    # mask_ref : (B_T, S_T, 1)  int32 (0/1) in VMEM, sublane-aligned with emb
    # out_ref  : (B_T, D)       float32, resident across the S grid axis
    # acc_ref  : (B_T, D)       float32 scratch (masked-sum accumulator)
    # cnt_ref  : (B_T, 1)       float32 scratch (valid-token count)
    s_idx = pl.program_id(1)

    @pl.when(s_idx == 0)
    def _init():
        acc_ref[...] = jnp.zeros_like(acc_ref)
        cnt_ref[...] = jnp.zeros_like(cnt_ref)

    # Upcast in-register (v5e has no bf16 VPU); accumulation stays in f32.
    emb = emb_ref[...].astype(jnp.float32)      # (B_T, S_T, D)
    mask = mask_ref[...].astype(jnp.float32)    # (B_T, S_T, 1)

    acc_ref[...] += jnp.sum(emb * mask, axis=1)   # masked sum over this S tile
    cnt_ref[...] += jnp.sum(mask, axis=1)         # (B_T, 1) token count

    @pl.when(s_idx == pl.num_programs(1) - 1)
    def _finalize():
        denom = jnp.maximum(cnt_ref[...], 1e-9)   # torch.clamp(min=1e-9)
        out_ref[...] = (acc_ref[...] / denom).astype(out_ref.dtype)


def _choose_tiles(B, S, D, itemsize, tile_budget_bytes=4 * 1024 * 1024):
    """Pick (B_T, S_T) obeying the (8,128)/full-dim BlockSpec rule and a per-
    buffer VMEM budget (pipeline double-buffers each input block)."""
    # Batch tile: multiple of 8 (so the (B_T, D) output block is legal) that
    # divides B, else the whole batch (block == full dim is always legal).
    b_t = B
    for cand in (32, 16, 8):
        if B % cand == 0:
            b_t = cand
            break

    # Sequence tile: largest multiple of 128 dividing S whose embedding tile
    # fits the budget; fall back to the smallest such divisor, or full S.
    s_cands = [c for c in (4096, 2048, 1024, 512, 256, 128) if S % c == 0]
    s_t = S
    for cand in s_cands:
        if b_t * cand * D * itemsize <= tile_budget_bytes:
            s_t = cand
            break
    else:
        if s_cands:
            s_t = s_cands[-1]
    return b_t, s_t


def pooling_mean(token_embeddings: jax.Array, attention_mask: jax.Array,
                 *, block_b: int | None = None,
                 block_s: int | None = None) -> jax.Array:
    """Masked mean pooling (Pooling module, pooling_mode='mean')."""
    B, S, D = token_embeddings.shape
    assert attention_mask.shape == (B, S)

    # Native dtype stays on the HBM wire; mask reshaped so S sits on sublanes.
    mask3 = attention_mask.astype(jnp.int32).reshape(B, S, 1)

    b_t, s_t = _choose_tiles(B, S, D, jnp.dtype(token_embeddings.dtype).itemsize)
    if block_b is not None:
        b_t = block_b
    if block_s is not None:
        s_t = block_s
    assert B % b_t == 0 and S % s_t == 0, "tiles must evenly divide (B, S)"

    grid = (B // b_t, S // s_t)

    out = pl.pallas_call(
        _mean_pool_kernel,
        out_shape=jax.ShapeDtypeStruct((B, D), jnp.float32),
        grid_spec=pltpu.PrefetchScalarGridSpec(
            num_scalar_prefetch=0,
            grid=grid,
            in_specs=[
                pl.BlockSpec((b_t, s_t, D), lambda b, s: (b, s, 0)),
                pl.BlockSpec((b_t, s_t, 1), lambda b, s: (b, s, 0)),
            ],
            # index_map ignores s -> output block resident across the reduction.
            out_specs=pl.BlockSpec((b_t, D), lambda b, s: (b, 0)),
            scratch_shapes=[
                pltpu.VMEM((b_t, D), jnp.float32),   # masked-sum accumulator
                pltpu.VMEM((b_t, 1), jnp.float32),   # token-count accumulator
            ],
        ),
        compiler_params=pltpu.CompilerParams(
            dimension_semantics=("parallel", "arbitrary"),
        ),
    )(token_embeddings, mask3)
    return out


def pooling_mean_reference(token_embeddings, attention_mask):
    """Pure-JAX reference mirroring the PyTorch forward (mean mode)."""
    mask = attention_mask.astype(jnp.float32)[:, :, None]
    sum_emb = jnp.sum(token_embeddings.astype(jnp.float32) * mask, axis=1)
    sum_mask = jnp.clip(jnp.sum(mask, axis=1), 1e-9, None)
    return sum_emb / sum_mask


if __name__ == "__main__":
    # Small shapes consistent with the module: batch=2, seq=16, hidden=32.
    B, S, D = 2, 16, 32
    key = jax.random.PRNGKey(0)
    k_emb, _ = jax.random.split(key)

    token_embeddings = jax.random.normal(k_emb, (B, S, D), dtype=jnp.float32)

    # Deterministic attention mask with variable lengths (first `len` tokens valid).
    lengths = jnp.array([5, 16], dtype=jnp.int32)
    positions = jnp.arange(S, dtype=jnp.int32)[None, :]
    attention_mask = (positions < lengths[:, None]).astype(jnp.int32)  # (B, S)

    expected = pooling_mean_reference(token_embeddings, attention_mask)

    # 1) Forced multi-tile reduction over S (exercises init/accumulate/finalize).
    out_tiled = pooling_mean(token_embeddings, attention_mask,
                             block_b=B, block_s=8)
    out_tiled = jax.block_until_ready(out_tiled)
    assert out_tiled.shape == (B, D)
    assert jnp.allclose(out_tiled, expected, atol=1e-5, rtol=1e-5)

    # 2) Auto tile selection (single block for these toy shapes).
    out_auto = jax.block_until_ready(pooling_mean(token_embeddings, attention_mask))
    assert jnp.allclose(out_auto, expected, atol=1e-5, rtol=1e-5)

    # 3) Native bf16 on the wire, f32 accumulation inside the kernel.
    emb_bf16 = token_embeddings.astype(jnp.bfloat16)
    out_bf16 = jax.block_until_ready(
        pooling_mean(emb_bf16, attention_mask, block_b=B, block_s=8))
    expected_bf16 = pooling_mean_reference(emb_bf16, attention_mask)
    assert jnp.allclose(out_bf16, expected_bf16, atol=1e-2, rtol=1e-2)

    print("KERNEL_OK")
</pallas_src>

<mosaic_0001>
module attributes {stable_mosaic.version = 11 : i64} {
  func.func @_mean_pool_kernel(%arg0: i32, %arg1: i32, %arg2: memref<2x8x32xf32, #tpu.memory_space<vmem>>, %arg3: memref<2x8x1xi32, #tpu.memory_space<vmem>>, %arg4: memref<2x32xf32, #tpu.memory_space<vmem>>, %arg5: memref<2x32xf32, #tpu.memory_space<vmem>>, %arg6: memref<2x1xf32, #tpu.memory_space<vmem>>) attributes {dimension_semantics = [#tpu.dimension_semantics<parallel>, #tpu.dimension_semantics<arbitrary>], iteration_bounds = array<i64: 1, 2>, scalar_prefetch = 0 : i64, scratch_operands = 2 : i64, tpu.core_type = #tpu.core_type<tc>, window_params = [{transform_indices = @transform_0, window_bounds = array<i64: 2, 8, 32>}, {transform_indices = @transform_1, window_bounds = array<i64: 2, 8, 1>}, {transform_indices = @transform_2, window_bounds = array<i64: 2, 32>}]} {
    %c0_i32 = arith.constant 0 : i32
    %0 = arith.cmpi eq, %arg1, %c0_i32 : i32
    %1 = arith.extui %0 : i1 to i32
    %c0_i32_0 = arith.constant 0 : i32
    %2 = arith.cmpi ne, %1, %c0_i32_0 : i32
    scf.if %2 {
      %cst_16 = arith.constant 0.000000e+00 : f32
      %19 = vector.broadcast %cst_16 : f32 to vector<2x32xf32>
      %c0_17 = arith.constant 0 : index
      %c0_18 = arith.constant 0 : index
      %20 = vector.load %arg5[%c0_17, %c0_18] : memref<2x32xf32, #tpu.memory_space<vmem>>, vector<2x32xf32>
      tpu.vector_store %arg5[%c0_17, %c0_18], %19 {strides = array<i32>} : memref<2x32xf32, #tpu.memory_space<vmem>>, vector<2x32xf32>,
      %cst_19 = arith.constant 0.000000e+00 : f32
      %21 = vector.broadcast %cst_19 : f32 to vector<2x1xf32>
      %c0_20 = arith.constant 0 : index
      %c0_21 = arith.constant 0 : index
      %22 = vector.load %arg6[%c0_20, %c0_21] : memref<2x1xf32, #tpu.memory_space<vmem>>, vector<2x1xf32>
      tpu.vector_store %arg6[%c0_20, %c0_21], %21 {strides = array<i32>} : memref<2x1xf32, #tpu.memory_space<vmem>>, vector<2x1xf32>,
    } else {
    }
    %c0 = arith.constant 0 : index
    %c0_1 = arith.constant 0 : index
    %c0_2 = arith.constant 0 : index
    %3 = vector.load %arg2[%c0, %c0_1, %c0_2] : memref<2x8x32xf32, #tpu.memory_space<vmem>>, vector<2x8x32xf32>
    %c0_3 = arith.constant 0 : index
    %c0_4 = arith.constant 0 : index
    %c0_5 = arith.constant 0 : index
    %4 = vector.load %arg3[%c0_3, %c0_4, %c0_5] : memref<2x8x1xi32, #tpu.memory_space<vmem>>, vector<2x8x1xi32>
    %5 = arith.sitofp %4 : vector<2x8x1xi32> to vector<2x8x1xf32>
    %c0_6 = arith.constant 0 : index
    %c0_7 = arith.constant 0 : index
    %6 = vector.load %arg5[%c0_6, %c0_7] : memref<2x32xf32, #tpu.memory_space<vmem>>, vector<2x32xf32>
    %7 = vector.broadcast %5 : vector<2x8x1xf32> to vector<2x8x32xf32>
    %8 = arith.mulf %3, %7 : vector<2x8x32xf32>
    %cst = arith.constant dense<0.000000e+00> : vector<2x32xf32>
    %9 = vector.multi_reduction <add>, %8, %cst [1] : vector<2x8x32xf32> to vector<2x32xf32>
    %10 = arith.addf %6, %9 : vector<2x32xf32>
    %c0_8 = arith.constant 0 : index
    %c0_9 = arith.constant 0 : index
    %11 = vector.load %arg5[%c0_8, %c0_9] : memref<2x32xf32, #tpu.memory_space<vmem>>, vector<2x32xf32>
    tpu.vector_store %arg5[%c0_8, %c0_9], %10 {strides = array<i32>} : memref<2x32xf32, #tpu.memory_space<vmem>>, vector<2x32xf32>,
    %c0_10 = arith.constant 0 : index
    %c0_11 = arith.constant 0 : index
    %12 = vector.load %arg6[%c0_10, %c0_11] : memref<2x1xf32, #tpu.memory_space<vmem>>, vector<2x1xf32>
    %cst_12 = arith.constant dense<0.000000e+00> : vector<2x1xf32>
    %13 = vector.multi_reduction <add>, %5, %cst_12 [1] : vector<2x8x1xf32> to vector<2x1xf32>
    %14 = arith.addf %12, %13 : vector<2x1xf32>
    %c0_13 = arith.constant 0 : index
    %c0_14 = arith.constant 0 : index
    %15 = vector.load %arg6[%c0_13, %c0_14] : memref<2x1xf32, #tpu.memory_space<vmem>>, vector<2x1xf32>
    tpu.vector_store %arg6[%c0_13, %c0_14], %14 {strides = array<i32>} : memref<2x1xf32, #tpu.memory_space<vmem>>, vector<2x1xf32>,
    %c1_i32 = arith.constant 1 : i32
    %16 = arith.cmpi eq, %arg1, %c1_i32 : i32
    %17 = arith.extui %16 : i1 to i32
    %c0_i32_15 = arith.constant 0 : i32
    %18 = arith.cmpi ne, %17, %c0_i32_15 : i32
    scf.if %18 {
      %c0_16 = arith.constant 0 : index
      %c0_17 = arith.constant 0 : index
      %19 = vector.load %arg6[%c0_16, %c0_17] : memref<2x1xf32, #tpu.memory_space<vmem>>, vector<2x1xf32>
      %cst_18 = arith.constant 9.99999971E-10 : f32
      %20 = vector.broadcast %cst_18 : f32 to vector<2x1xf32>
      %21 = arith.maximumf %19, %20 : vector<2x1xf32>
      %c0_19 = arith.constant 0 : index
      %c0_20 = arith.constant 0 : index
      %22 = vector.load %arg5[%c0_19, %c0_20] : memref<2x32xf32, #tpu.memory_space<vmem>>, vector<2x32xf32>
      %23 = vector.broadcast %21 : vector<2x1xf32> to vector<2x32xf32>
      %24 = arith.divf %22, %23 : vector<2x32xf32>
      %c0_21 = arith.constant 0 : index
      %c0_22 = arith.constant 0 : index
      %25 = vector.load %arg4[%c0_21, %c0_22] : memref<2x32xf32, #tpu.memory_space<vmem>>, vector<2x32xf32>
      tpu.vector_store %arg4[%c0_21, %c0_22], %24 {strides = array<i32>} : memref<2x32xf32, #tpu.memory_space<vmem>>, vector<2x32xf32>,
    } else {
    }
    return
  }
  func.func @transform_0(%arg0: i32, %arg1: i32) -> (i32, i32, i32) {
    %c0_i32 = arith.constant 0 : i32
    %c0_i32_0 = arith.constant 0 : i32
    return %arg0, %arg1, %c0_i32 : i32, i32, i32
  }
  func.func @transform_1(%arg0: i32, %arg1: i32) -> (i32, i32, i32) {
    %c0_i32 = arith.constant 0 : i32
    %c0_i32_0 = arith.constant 0 : i32
    return %arg0, %arg1, %c0_i32 : i32, i32, i32
  }
  func.func @transform_2(%arg0: i32, %arg1: i32) -> (i32, i32) {
    %c0_i32 = arith.constant 0 : i32
    %c0_i32_0 = arith.constant 0 : i32
    return %arg0, %c0_i32 : i32, i32
  }
}

</mosaic_0001>

<bundles_post_ra>
// kernel: tpu_custom_call.1
= control target key start
LH: loop header
LB: loop body
LE: loop exit
PB: predicated region body
PF: predicated region fallthrough
CT: control target
= control target key end

     0   :  { %7 = vsyncpa [#allocation7], 0  ;;  %s589_s9 = smov 0   ;;  %s591_s10 = smov 0   ;;  %s695_s0 = inlined_call_operand.vmem [shape: f32[2,16,32], index: 0, kind: input, shape index: {}]   ;;  %s696_s1 = inlined_call_operand.vmem [shape: s32[2,16,1], index: 1, kind: input, shape index: {}]   ;;  %s697_s2 = inlined_call_operand.hbm [shape: f32[2,32], index: 2, kind: output, shape index: {}]  }
   0x1   :  { %s593_s11 = smov 0   ;;  %s595_s12 = smov 0  }
   0x2   :  { %s597_s13 = smov 0  }
   0x3 LB: > { %s432_s14 = sadd.s32 4294967295, %s568_s13   ;;  %s22_s15 = sadd.s32 1, %s564_s12  ;;  %s568_s13 = sphi %s597_s13, %s13_s13   ;;  %s564_s12 = sphi %s595_s12, %s703_s12   ;;  %s560_s11 = sphi %s593_s11, %s702_s11   ;;  %s556_s10 = sphi %s591_s10, %s701_s10   ;;  %s552_s9 = sphi %s589_s9, %s700_s9  }
   0x4   : > { %p23_p0 = scmp.ge.s32.totalorder %s22_s15, 2  ;;  %p41_p1 = scmp.ne.s32.totalorder %s556_s10, %s552_s9 }
   0x5   : > { %p42_p2 = scmp.eq.s32.totalorder %s568_s13, 0  ;;  %s34_s18 = sadd.s32 1, %s556_s10 }
   0x6   : > { %s705_s15 = smov (%p23_p0, %s22_s15), 0  ;;  %p434_p5 = scmp.ge.s32.totalorder %s568_s13, 2 }
   0x7   : > { %p621_p3 = por %p42_p2, %p41_p1  ;;  %s30_s17 = ssub.s32 %s564_s12, %s705_s15 }
   0x8   : > { %p32_p4 = scmp.eq.s32.totalorder %s30_s17, 0  ;;  %121 = sbr.rel (%p434_p5) target bundleno = 23 (0x17), region = 16 }
   0xa   : > { %s629_s19 = scalar_select %p32_p4, %s556_s10, %s34_s18  }
   0xd   : > { %124 = sbr.rel (!%p621_p3) target bundleno = 18 (0x12), region = 20  ;;  %s126_s20 = sand.u32 (%p621_p3), 1, %s556_s10  }
   0xe   : > { %s436_s21 = sshll.u32 (%p621_p3), %s564_s12, 3  ;;  %s435_s22 = sshll.u32 (%p621_p3), %s126_s20, 4 }
   0xf   : > { %s133_s25 = scalar_lea.vmem (%p621_p3), %s695_s0, %s436_s21  ;;  %s128_s26 = scalar_lea.vmem (%p621_p3), [#allocation4], %s435_s22 }
  0x10   : > { %v164_v0 = vld [vmem:[%s133_s25] sm:$0xff] (%p621_p3)  ;;  %v166_v1 = vld [vmem:[%s133_s25 + $0x10] sm:$0xff] (%p621_p3) }
  0x11   : > { %165 = vst [vmem:[%s128_s26] sm:$0xff] (%p621_p3), %v164_v0  ;;  %167 = vst [vmem:[%s128_s26 + $0x8] sm:$0xff] (%p621_p3), %v166_v1 }
  0x12 PF: > { %173 = sbr.rel (!%p621_p3) target bundleno = 23 (0x17), region = 58  ;;  %s175_s27 = sand.u32 (%p621_p3), 1, %s556_s10  }
  0x13   : > { %s438_s28 = sshll.u32 (%p621_p3), %s564_s12, 3  ;;  %s437_s29 = sshll.u32 (%p621_p3), %s175_s27, 4 }
  0x14   : > { %s182_s4 = scalar_lea.vmem (%p621_p3), %s696_s1, %s438_s28  ;;  %s177_s5 = scalar_lea.vmem (%p621_p3), [#allocation5], %s437_s29 }
  0x15   : > { %v213_v2 = vld [vmem:[%s182_s4] sm:$0xff] (%p621_p3)  ;;  %v215_v3 = vld [vmem:[%s182_s4 + $0x10] sm:$0xff] (%p621_p3) }
  0x16   : > { %214 = vst [vmem:[%s177_s5] sm:$0xff] (%p621_p3), %v213_v2  ;;  %216 = vst [vmem:[%s177_s5 + $0x8] sm:$0xff] (%p621_p3), %v215_v3 }
  0x17 PF: > { %p439_p6 = scmp.ge.s32.totalorder %s568_s13, 1  ;;  %p221_p7 = scmp.lt.s32.totalorder %s568_s13, 3 }
  0x19   : > { %p222_p8 = pnand %p439_p6, %p221_p7 }
  0x1a   : > { %s228_s6 = sand.u32 (!%p222_p8), 1, %s552_s9   ;;  %p442_p9 = scmp.ne.s32.totalorder (!%p222_p8), %s560_s11, 0 }
  0x1b   : > { %225 = sbr.rel (%p222_p8) target bundleno = 349 (0x15d), region = 96  ;;  %s649_s7 = sshll.u32 (!%p222_p8), %s228_s6, 4 }
  0x1c   : > { %s230_s8 = scalar_lea.vmem (!%p222_p8), [#allocation4], %s649_s7  ;;  %s237_s16 = scalar_lea.vmem (!%p222_p8), [#allocation5], %s649_s7 }
  0x20   : > { %260 = sbr.rel (%p442_p9) target bundleno = 40 (0x28), region = 108 }
  0x25   : > { %vm261_vm0 = vcmask 254976   ;;  %vm263_vm1 = vcmask 1024   ;;  %v570_v4 = vmov 0.0  }
  0x26   : > { %262 = vst.msk [vmem:[#allocation2] sm:$0x3] %vm261_vm0, %v570_v4 }
  0x27   : > { %264 = vst.msk [vmem:[#allocation3] sm:$0x3] %vm263_vm1, %v570_v4 }
  0x28 PF: > { %v267_v5 = vld [vmem:[%s237_s16] sm:$0xff]  ;;  %vm308_vm2 = vcmask 7168   ;;  %v268_v6 = vld [vmem:[%s237_s16 + $0x8] sm:$0xff]  ;;  %v571_v7 = vmov 0   ;;  %vm301_vm3 = vcmask 1041409   ;;  %vm328_vm4 = vcmask 1024  }
  0x29   : > { %498 = vset.pattern.permute.xlu0 %v571_v7  ;;  %v269_v8 = vcvt.s32.f32 %v267_v5  ;;  %v270_v9 = vcvt.s32.f32 %v268_v6  ;;  %v265_v27 = vld [vmem:[%s230_s8] sm:$0xff]  ;;  %vm284_vm5 = vcmask 261120   ;;  %v266_v30 = vld [vmem:[%s230_s8 + $0x8] sm:$0xff]  ;;  %vm305_vm6 = vcmask 254976   ;;  %p443_p10 = scmp.ne.s32.totalorder %s560_s11, 1 }
  0x2b   : > { %274 = vperm.xlu0 %498, %v269_v8   ;;  %v309_v10 = vsel %vm308_vm2, %v269_v8, 0.0  ;;  %v316_v11 = vsel %vm308_vm2, %v270_v9, 0.0 }
  0x2c   : > { %v310_v12 = vrot.slane %v309_v10, 4  ;;  %v317_v13 = vrot.slane %v316_v11, 4 }
  0x2d   : > { %v271_v46 = vld [vmem:[#allocation2] sm:$0x3] }
  0x2e   : > { %v311_v14 = vadd.f32 %v310_v12, %v309_v10  ;;  %v318_v15 = vadd.f32 %v317_v13, %v316_v11  ;;  %v307_v23 = vld [vmem:[#allocation3] sm:$0x3] }
  0x2f   : > { %279 = vperm.xlu0 %498, %v270_v9  }
  0x30   : > { %v312_v16 = vrot.slane %v311_v14, 2  ;;  %v319_v17 = vrot.slane %v318_v15, 2 }
  0x32   : > { %v313_v18 = vadd.f32 %v312_v16, %v311_v14  ;;  %v320_v19 = vadd.f32 %v319_v17, %v318_v15 }
  0x34   : > { %v314_v20 = vrot.slane %v313_v18, 1  ;;  %v321_v21 = vrot.slane %v320_v19, 1 }
  0x36   : > { %v315_v22 = vadd.f32 %v314_v20, %v313_v18  ;;  %v322_v24 = vadd.f32 %v321_v21, %v320_v19 }
  0x38   : > { %v325_v25 = vsel %vm301_vm3, %v322_v24, %v315_v22 }
  0x39   : > { %v327_v26 = vadd.f32 %v325_v25, %v307_v23 }
  0x3b   : > { %329 = vst.msk [vmem:[#allocation3] sm:$0x3] %vm328_vm4, %v327_v26 }
  0xa6   : > { %v275_v28 = vpop.permute.xlu0 %274 }
  0xa7   : > { %v282_v29 = vmul.f32 %v275_v28, %v265_v27 }
  0xa9   : > { %v285_v31 = vsel %vm284_vm5, %v282_v29, 0.0 }
  0xaa   : > { %v286_v32 = vrot.slane %v285_v31, 4  ;;  %v280_v33 = vpop.permute.xlu0 %279 }
  0xab   : > { %v283_v34 = vmul.f32 %v280_v33, %v266_v30 }
  0xac   : > { %v287_v35 = vadd.f32 %v286_v32, %v285_v31 }
  0xad   : > { %v292_v36 = vsel %vm284_vm5, %v283_v34, 0.0 }
  0xae   : > { %v288_v37 = vrot.slane %v287_v35, 2  ;;  %v293_v38 = vrot.slane %v292_v36, 4 }
  0xb0   : > { %v289_v39 = vadd.f32 %v288_v37, %v287_v35  ;;  %v294_v40 = vadd.f32 %v293_v38, %v292_v36 }
  0xb2   : > { %v295_v41 = vrot.slane %v294_v40, 2  ;;  %v290_v42 = vrot.slane %v289_v39, 1 }
  0xb4   : > { %v296_v43 = vadd.f32 %v295_v41, %v294_v40  ;;  %v291_v45 = vadd.f32 %v290_v42, %v289_v39 }
  0xb6   : > { %v297_v44 = vrot.slane %v296_v43, 1 }
  0xb8   : > { %v298_v47 = vadd.f32 %v297_v44, %v296_v43 }
  0xb9   : > { %333 = sbr.rel (%p443_p10) target bundleno = 334 (0x14e), region = 112 }
  0xba   : > { %v302_v48 = vsel %vm301_vm3, %v298_v47, %v291_v45 }
  0xbb   : > { %v304_v49 = vadd.f32 %v302_v48, %v271_v46 }
  0xbd   : > { %306 = vst.msk [vmem:[#allocation2] sm:$0x3] %vm305_vm6, %v304_v49 }
  0xbe   : > { %v334_v50 = vld [vmem:[#allocation3] sm:$0x3]  ;;  %v572_v51 = vmov 0  }
  0xbf   : > { %499 = vset.pattern.permute.xlu0 %v572_v51  ;;  %v335_v52 = vmax.f32 %v334_v50, 1e-09 }
  0xc1   : > { %339 = vperm.xlu0 %499, %v335_v52  }
  0xc4   : > { %v336_v54 = vld [vmem:[#allocation2] sm:$0x3] }
 0x13c   : > { %v340_v53 = vpop.permute.xlu0 %339 }
 0x13d   : > { %500 = vrcp.f32 %v340_v53 }
 0x14a   : > { %v501_v55 = vpop.eup %500 }
 0x14b   : > { %v343_v56 = vmul.f32 %v501_v55, %v336_v54 }
 0x14d   : > { %344 = vst.msk [vmem:[#allocation6] sm:$0x3] %vm305_vm6, %v343_v56 }
 0x14e PF: > { %p665_p11 = scmp.eq.s32.totalorder %s432_s14, 1  ;;  %s573_s11 = smov [#allocation6]  }
 0x14f   : > { %s354_s17 = sshll.u32 %s573_s11, 4  ;;  %s355_s17 = int_to_ptr.vmem [resolvable:$true] %s354_s17 }
 0x150   : > { %s502_s18 = scalar_lea.vmem %s355_s17, 32  ;;  %p509_p1 = scmp.lt.s32.totalorder %s355_s17, %s355_s17 }
 0x151   : > { %p503_p12 = scmp.ne.s32.totalorder %s355_s17, %s502_s18  ;;  %p510_p2 = scmp.lt.s32.totalorder %s502_s18, %s502_s18 }
 0x153   : > { %p504_p13 = pnand %p503_p12, %p665_p11  ;;  %p511_p3 = por %p510_p2, %p509_p1 }
 0x155   : > { %p505_p0 = pneg %p504_p13 }
 0x157   : > { %p512_p4 = pnand %p511_p3, %p505_p0 }
 0x159   : > { %515 = shalt.err (!%p512_p4)
}
 0x15a   : > { %449 = dma.vmem_to_hbm [thread:$0]  (%p665_p11), %s355_s17, 32, %s697_s2, [#allocation7]  }
 0x15b   : > { %547 = dma.done.wait (%p665_p11), [#allocation7], 32  }
 0x15c   : > { %549 = vsyncadd (%p665_p11), [#allocation7], 4294967264 }
 0x15d PF: > { %s13_s13 = sadd.s32 1, %s568_s13   ;;  %s700_s9 = smov %s556_s10 }
 0x15e   : > { %p10_p5 = scmp.ge.s32.totalorder %s13_s13, 4   ;;  %s701_s10 = smov %s629_s19 }
 0x15f   : > { %s702_s11 = smov %s564_s12  ;;  %s703_s12 = smov %s705_s15 }
 0x160   :  { %12 = sbr.rel (!%p10_p5) target bundleno = 3 (0x3), region = 153 }
 0x165   :  { %367 = vsyncpa [#allocation7], 1 }
 0x166   :  { %369 = vsyncpa [#allocation7 + $0x1], 1 }

</bundles_post_ra>
